<compile_context>
chip_gen: v6e
topology: v6e:2x2x1
jax: 0.10.0
libtpu: 0.0.40
codegen_flags: <defaults>
</compile_context>

<pallas_src>
import math
from functools import partial

import numpy as np
import jax
import jax.numpy as jnp
from jax.experimental import pallas as pl
from jax.experimental.pallas import tpu as pltpu

# ---- module hyper-parameters (defaults of FourierEmbedder.__init__) ----
NUM_FREQS = 6
INPUT_DIM = 3
INCLUDE_INPUT = True
INCLUDE_PI = True
LOGSPACE = True
OUT_DIM = INPUT_DIM * (2 * NUM_FREQS + (1 if (INCLUDE_INPUT or NUM_FREQS == 0) else 0))

# The kernel below exploits the power-of-two frequency ladder (logspace + pi):
# anchors at k=0 and k=3, double-angle for the rest.
assert LOGSPACE and INCLUDE_PI and NUM_FREQS == 6 and INPUT_DIM == 3

# Frequencies exactly as the torch __init__ computes them (for the reference).
_FREQS_F32 = (2.0 ** np.arange(NUM_FREQS, dtype=np.float32)) * np.float32(np.pi)


def fourier_kernel(xt_ref, o_ref):
    """One grid step.

    xt_ref: (INPUT_DIM, TN)  feature-major input tile (lane-dense: points on lanes)
    o_ref:  (TN, OUT_DIM)    point-major output tile, identical layout to the
                             module output: [x(3) | sin(18, d-major/f-minor) | cos(18)]
    """
    x = xt_ref[...].astype(jnp.float32)                       # (3, TN)

    # --- anchor angles, packed into one sublane group for full VPU occupancy ---
    # rows 0..2 : pi   * x_d   (octave k=0)
    # rows 3..5 : 8*pi * x_d   (octave k=3)
    # Only scalar Python constants are used -> nothing is captured by the kernel.
    ang = jnp.concatenate([x * math.pi, x * (8.0 * math.pi)], axis=0)   # (6, TN)
    sa = jnp.sin(ang)                                                   # k in {0, 3}
    ca = jnp.cos(ang)

    # --- double-angle recurrence for the remaining octaves ---
    sb = 2.0 * sa * ca                                                  # k in {1, 4}
    cb = 2.0 * ca * ca - 1.0
    sc2 = 2.0 * sb * cb                                                 # k in {2, 5}
    cc2 = 2.0 * cb * cb - 1.0

    d0, d1 = 0, INPUT_DIM
    S = {0: sa[d0:d1], 1: sb[d0:d1], 2: sc2[d0:d1],
         3: sa[d1:2 * d1], 4: sb[d1:2 * d1], 5: sc2[d1:2 * d1]}          # each (3, TN)
    C = {0: ca[d0:d1], 1: cb[d0:d1], 2: cc2[d0:d1],
         3: ca[d1:2 * d1], 4: cb[d1:2 * d1], 5: cc2[d1:2 * d1]}

    # --- assemble the (40, TN) feature-major slab in final column order ---
    rows = [x[d:d + 1] for d in range(INPUT_DIM)] if INCLUDE_INPUT else []
    rows += [S[k][d:d + 1] for d in range(INPUT_DIM) for k in range(NUM_FREQS)]
    rows += [C[k][d:d + 1] for d in range(INPUT_DIM) for k in range(NUM_FREQS)]
    pad = (-len(rows)) % 8                       # 39 -> 40 so the transpose is 8-aligned
    rows += [jnp.zeros_like(rows[0])] * pad
    slab = jnp.concatenate(rows, axis=0)         # (40, TN)

    # --- on-chip transpose (XLU) and single coalesced point-major store ---
    outp = jnp.transpose(slab, (1, 0))           # (TN, 40)
    o_ref[...] = outp[:, :OUT_DIM].astype(o_ref.dtype)


def _round_up(v: int, m: int) -> int:
    return ((v + m - 1) // m) * m


@partial(jax.jit, static_argnames=("tn",))
def fourier_embed(x: jnp.ndarray, tn: int = 16384) -> jnp.ndarray:
    """FourierEmbedder.forward via a Pallas TPU kernel.

    x: (..., INPUT_DIM) -> (..., OUT_DIM)
    tn: lane tile (flattened points per grid step); rounded to a multiple of
        128, clamped to the problem size and capped so the grid has >= ~8
        steps (keeps both v7x TensorCores busy).
    """
    if NUM_FREQS == 0:
        return x  # matches torch: identity when num_freqs == 0

    lead = x.shape[:-1]
    d = x.shape[-1]
    if d != INPUT_DIM:
        raise ValueError(f"expected last dim {INPUT_DIM}, got {d}")
    n = int(np.prod(lead)) if lead else 1
    out_dtype = jnp.promote_types(x.dtype, jnp.float32)  # torch promotes vs f32 freqs

    # Small feature-major relayout (N,3)->(3,N); done under jit, ~24 B/point.
    xt = x.reshape(n, d).T

    n128 = _round_up(n, 128)
    cap = max(128, _round_up(-(-n // 8), 128))           # aim for >= 8 grid steps
    tn_eff = max(128, min(_round_up(tn, 128), n128, cap))
    grid = (pl.cdiv(n, tn_eff),)                          # ragged last block is masked

    out = pl.pallas_call(
        fourier_kernel,
        out_shape=jax.ShapeDtypeStruct((n, OUT_DIM), out_dtype),
        grid=grid,
        in_specs=[pl.BlockSpec((INPUT_DIM, tn_eff), lambda i: (0, i))],
        out_specs=pl.BlockSpec((tn_eff, OUT_DIM), lambda i: (i, 0)),
        compiler_params=pltpu.CompilerParams(
            dimension_semantics=("parallel",),
            # ~28 MB worst-case footprint at tn=16384 (padded out blocks +
            # temporaries); 48 MiB is safe headroom on v5e/v6e (128 MiB VMEM)
            # and within v7x's 64 MiB.
            vmem_limit_bytes=48 * 1024 * 1024,
        ),
    )(xt)

    return out.reshape(*lead, OUT_DIM)


def _reference(x: jnp.ndarray) -> jnp.ndarray:
    """Pure-JAX reference of the torch forward."""
    freqs = jnp.asarray(_FREQS_F32)
    embed = (x[..., None] * freqs).reshape(*x.shape[:-1], -1)
    return jnp.concatenate([x, jnp.sin(embed), jnp.cos(embed)], axis=-1)


if __name__ == "__main__":
    key = jax.random.PRNGKey(0)
    k1, k2 = jax.random.split(key)

    # Small shape consistent with the module: (batch=2, seq=8, input_dim=3).
    x1 = jax.random.normal(k1, (2, 8, INPUT_DIM), dtype=jnp.float32)
    out1 = jax.block_until_ready(fourier_embed(x1))
    assert out1.shape == (2, 8, OUT_DIM)
    np.testing.assert_allclose(np.asarray(out1), np.asarray(_reference(x1)),
                               rtol=1e-5, atol=2e-5)

    # Second case exercising a multi-step grid with a ragged last block.
    x2 = jax.random.normal(k2, (2, 200, INPUT_DIM), dtype=jnp.float32)
    out2 = jax.block_until_ready(fourier_embed(x2, tn=256))
    assert out2.shape == (2, 200, OUT_DIM)
    np.testing.assert_allclose(np.asarray(out2), np.asarray(_reference(x2)),
                               rtol=1e-5, atol=2e-5)

    print("KERNEL_OK")
</pallas_src>

<mosaic_0001>
module attributes {stable_mosaic.version = 11 : i64} {
  func.func @fourier_kernel(%arg0: i32, %arg1: memref<3x128xf32, #tpu.memory_space<vmem>>, %arg2: memref<128x39xf32, #tpu.memory_space<vmem>>) attributes {dimension_semantics = [#tpu.dimension_semantics<parallel>], iteration_bounds = array<i64: 1>, scalar_prefetch = 0 : i64, scratch_operands = 0 : i64, tpu.core_type = #tpu.core_type<tc>, window_params = [{transform_indices = @transform_0, window_bounds = array<i64: 3, 128>}, {transform_indices = @transform_1, window_bounds = array<i64: 128, 39>}]} {
    %c0 = arith.constant 0 : index
    %c0_0 = arith.constant 0 : index
    %0 = vector.load %arg1[%c0, %c0_0] : memref<3x128xf32, #tpu.memory_space<vmem>>, vector<3x128xf32>
    %cst = arith.constant 3.14159274 : f32
    %1 = vector.broadcast %cst : f32 to vector<3x128xf32>
    %2 = arith.mulf %0, %1 : vector<3x128xf32>
    %cst_1 = arith.constant 25.1327419 : f32
    %3 = vector.broadcast %cst_1 : f32 to vector<3x128xf32>
    %4 = arith.mulf %0, %3 : vector<3x128xf32>
    %5 = tpu.concatenate %2, %4 in 0 : vector<3x128xf32>, vector<3x128xf32> -> vector<6x128xf32>
    %6 = math.sin %5 : vector<6x128xf32>
    %7 = math.cos %5 : vector<6x128xf32>
    %cst_2 = arith.constant 2.000000e+00 : f32
    %8 = vector.broadcast %cst_2 : f32 to vector<6x128xf32>
    %9 = arith.mulf %8, %6 : vector<6x128xf32>
    %10 = arith.mulf %9, %7 : vector<6x128xf32>
    %cst_3 = arith.constant 2.000000e+00 : f32
    %11 = vector.broadcast %cst_3 : f32 to vector<6x128xf32>
    %12 = arith.mulf %11, %7 : vector<6x128xf32>
    %13 = arith.mulf %12, %7 : vector<6x128xf32>
    %cst_4 = arith.constant 1.000000e+00 : f32
    %14 = vector.broadcast %cst_4 : f32 to vector<6x128xf32>
    %15 = arith.subf %13, %14 : vector<6x128xf32>
    %cst_5 = arith.constant 2.000000e+00 : f32
    %16 = vector.broadcast %cst_5 : f32 to vector<6x128xf32>
    %17 = arith.mulf %16, %10 : vector<6x128xf32>
    %18 = arith.mulf %17, %15 : vector<6x128xf32>
    %cst_6 = arith.constant 2.000000e+00 : f32
    %19 = vector.broadcast %cst_6 : f32 to vector<6x128xf32>
    %20 = arith.mulf %19, %15 : vector<6x128xf32>
    %21 = arith.mulf %20, %15 : vector<6x128xf32>
    %cst_7 = arith.constant 1.000000e+00 : f32
    %22 = vector.broadcast %cst_7 : f32 to vector<6x128xf32>
    %23 = arith.subf %21, %22 : vector<6x128xf32>
    %24 = vector.extract_strided_slice %6 {offsets = [0, 0], sizes = [3, 128], strides = [1, 1]} : vector<6x128xf32> to vector<3x128xf32>
    %25 = vector.extract_strided_slice %10 {offsets = [0, 0], sizes = [3, 128], strides = [1, 1]} : vector<6x128xf32> to vector<3x128xf32>
    %26 = vector.extract_strided_slice %18 {offsets = [0, 0], sizes = [3, 128], strides = [1, 1]} : vector<6x128xf32> to vector<3x128xf32>
    %27 = vector.extract_strided_slice %6 {offsets = [3, 0], sizes = [3, 128], strides = [1, 1]} : vector<6x128xf32> to vector<3x128xf32>
    %28 = vector.extract_strided_slice %10 {offsets = [3, 0], sizes = [3, 128], strides = [1, 1]} : vector<6x128xf32> to vector<3x128xf32>
    %29 = vector.extract_strided_slice %18 {offsets = [3, 0], sizes = [3, 128], strides = [1, 1]} : vector<6x128xf32> to vector<3x128xf32>
    %30 = vector.extract_strided_slice %7 {offsets = [0, 0], sizes = [3, 128], strides = [1, 1]} : vector<6x128xf32> to vector<3x128xf32>
    %31 = vector.extract_strided_slice %15 {offsets = [0, 0], sizes = [3, 128], strides = [1, 1]} : vector<6x128xf32> to vector<3x128xf32>
    %32 = vector.extract_strided_slice %23 {offsets = [0, 0], sizes = [3, 128], strides = [1, 1]} : vector<6x128xf32> to vector<3x128xf32>
    %33 = vector.extract_strided_slice %7 {offsets = [3, 0], sizes = [3, 128], strides = [1, 1]} : vector<6x128xf32> to vector<3x128xf32>
    %34 = vector.extract_strided_slice %15 {offsets = [3, 0], sizes = [3, 128], strides = [1, 1]} : vector<6x128xf32> to vector<3x128xf32>
    %35 = vector.extract_strided_slice %23 {offsets = [3, 0], sizes = [3, 128], strides = [1, 1]} : vector<6x128xf32> to vector<3x128xf32>
    %36 = vector.extract_strided_slice %0 {offsets = [0, 0], sizes = [1, 128], strides = [1, 1]} : vector<3x128xf32> to vector<1x128xf32>
    %37 = vector.extract_strided_slice %0 {offsets = [1, 0], sizes = [1, 128], strides = [1, 1]} : vector<3x128xf32> to vector<1x128xf32>
    %38 = vector.extract_strided_slice %0 {offsets = [2, 0], sizes = [1, 128], strides = [1, 1]} : vector<3x128xf32> to vector<1x128xf32>
    %39 = vector.extract_strided_slice %24 {offsets = [0, 0], sizes = [1, 128], strides = [1, 1]} : vector<3x128xf32> to vector<1x128xf32>
    %40 = vector.extract_strided_slice %25 {offsets = [0, 0], sizes = [1, 128], strides = [1, 1]} : vector<3x128xf32> to vector<1x128xf32>
    %41 = vector.extract_strided_slice %26 {offsets = [0, 0], sizes = [1, 128], strides = [1, 1]} : vector<3x128xf32> to vector<1x128xf32>
    %42 = vector.extract_strided_slice %27 {offsets = [0, 0], sizes = [1, 128], strides = [1, 1]} : vector<3x128xf32> to vector<1x128xf32>
    %43 = vector.extract_strided_slice %28 {offsets = [0, 0], sizes = [1, 128], strides = [1, 1]} : vector<3x128xf32> to vector<1x128xf32>
    %44 = vector.extract_strided_slice %29 {offsets = [0, 0], sizes = [1, 128], strides = [1, 1]} : vector<3x128xf32> to vector<1x128xf32>
    %45 = vector.extract_strided_slice %24 {offsets = [1, 0], sizes = [1, 128], strides = [1, 1]} : vector<3x128xf32> to vector<1x128xf32>
    %46 = vector.extract_strided_slice %25 {offsets = [1, 0], sizes = [1, 128], strides = [1, 1]} : vector<3x128xf32> to vector<1x128xf32>
    %47 = vector.extract_strided_slice %26 {offsets = [1, 0], sizes = [1, 128], strides = [1, 1]} : vector<3x128xf32> to vector<1x128xf32>
    %48 = vector.extract_strided_slice %27 {offsets = [1, 0], sizes = [1, 128], strides = [1, 1]} : vector<3x128xf32> to vector<1x128xf32>
    %49 = vector.extract_strided_slice %28 {offsets = [1, 0], sizes = [1, 128], strides = [1, 1]} : vector<3x128xf32> to vector<1x128xf32>
    %50 = vector.extract_strided_slice %29 {offsets = [1, 0], sizes = [1, 128], strides = [1, 1]} : vector<3x128xf32> to vector<1x128xf32>
    %51 = vector.extract_strided_slice %24 {offsets = [2, 0], sizes = [1, 128], strides = [1, 1]} : vector<3x128xf32> to vector<1x128xf32>
    %52 = vector.extract_strided_slice %25 {offsets = [2, 0], sizes = [1, 128], strides = [1, 1]} : vector<3x128xf32> to vector<1x128xf32>
    %53 = vector.extract_strided_slice %26 {offsets = [2, 0], sizes = [1, 128], strides = [1, 1]} : vector<3x128xf32> to vector<1x128xf32>
    %54 = vector.extract_strided_slice %27 {offsets = [2, 0], sizes = [1, 128], strides = [1, 1]} : vector<3x128xf32> to vector<1x128xf32>
    %55 = vector.extract_strided_slice %28 {offsets = [2, 0], sizes = [1, 128], strides = [1, 1]} : vector<3x128xf32> to vector<1x128xf32>
    %56 = vector.extract_strided_slice %29 {offsets = [2, 0], sizes = [1, 128], strides = [1, 1]} : vector<3x128xf32> to vector<1x128xf32>
    %57 = vector.extract_strided_slice %30 {offsets = [0, 0], sizes = [1, 128], strides = [1, 1]} : vector<3x128xf32> to vector<1x128xf32>
    %58 = vector.extract_strided_slice %31 {offsets = [0, 0], sizes = [1, 128], strides = [1, 1]} : vector<3x128xf32> to vector<1x128xf32>
    %59 = vector.extract_strided_slice %32 {offsets = [0, 0], sizes = [1, 128], strides = [1, 1]} : vector<3x128xf32> to vector<1x128xf32>
    %60 = vector.extract_strided_slice %33 {offsets = [0, 0], sizes = [1, 128], strides = [1, 1]} : vector<3x128xf32> to vector<1x128xf32>
    %61 = vector.extract_strided_slice %34 {offsets = [0, 0], sizes = [1, 128], strides = [1, 1]} : vector<3x128xf32> to vector<1x128xf32>
    %62 = vector.extract_strided_slice %35 {offsets = [0, 0], sizes = [1, 128], strides = [1, 1]} : vector<3x128xf32> to vector<1x128xf32>
    %63 = vector.extract_strided_slice %30 {offsets = [1, 0], sizes = [1, 128], strides = [1, 1]} : vector<3x128xf32> to vector<1x128xf32>
    %64 = vector.extract_strided_slice %31 {offsets = [1, 0], sizes = [1, 128], strides = [1, 1]} : vector<3x128xf32> to vector<1x128xf32>
    %65 = vector.extract_strided_slice %32 {offsets = [1, 0], sizes = [1, 128], strides = [1, 1]} : vector<3x128xf32> to vector<1x128xf32>
    %66 = vector.extract_strided_slice %33 {offsets = [1, 0], sizes = [1, 128], strides = [1, 1]} : vector<3x128xf32> to vector<1x128xf32>
    %67 = vector.extract_strided_slice %34 {offsets = [1, 0], sizes = [1, 128], strides = [1, 1]} : vector<3x128xf32> to vector<1x128xf32>
    %68 = vector.extract_strided_slice %35 {offsets = [1, 0], sizes = [1, 128], strides = [1, 1]} : vector<3x128xf32> to vector<1x128xf32>
    %69 = vector.extract_strided_slice %30 {offsets = [2, 0], sizes = [1, 128], strides = [1, 1]} : vector<3x128xf32> to vector<1x128xf32>
    %70 = vector.extract_strided_slice %31 {offsets = [2, 0], sizes = [1, 128], strides = [1, 1]} : vector<3x128xf32> to vector<1x128xf32>
    %71 = vector.extract_strided_slice %32 {offsets = [2, 0], sizes = [1, 128], strides = [1, 1]} : vector<3x128xf32> to vector<1x128xf32>
    %72 = vector.extract_strided_slice %33 {offsets = [2, 0], sizes = [1, 128], strides = [1, 1]} : vector<3x128xf32> to vector<1x128xf32>
    %73 = vector.extract_strided_slice %34 {offsets = [2, 0], sizes = [1, 128], strides = [1, 1]} : vector<3x128xf32> to vector<1x128xf32>
    %74 = vector.extract_strided_slice %35 {offsets = [2, 0], sizes = [1, 128], strides = [1, 1]} : vector<3x128xf32> to vector<1x128xf32>
    %cst_8 = arith.constant 0.000000e+00 : f32
    %75 = vector.broadcast %cst_8 : f32 to vector<1x128xf32>
    %76 = tpu.concatenate %36, %37, %38, %39, %40, %41, %42, %43, %44, %45, %46, %47, %48, %49, %50, %51 in 0 : vector<1x128xf32>, vector<1x128xf32>, vector<1x128xf32>, vector<1x128xf32>, vector<1x128xf32>, vector<1x128xf32>, vector<1x128xf32>, vector<1x128xf32>, vector<1x128xf32>, vector<1x128xf32>, vector<1x128xf32>, vector<1x128xf32>, vector<1x128xf32>, vector<1x128xf32>, vector<1x128xf32>, vector<1x128xf32> -> vector<16x128xf32>
    %77 = tpu.concatenate %52, %53, %54, %55, %56, %57, %58, %59, %60, %61, %62, %63, %64, %65, %66, %67 in 0 : vector<1x128xf32>, vector<1x128xf32>, vector<1x128xf32>, vector<1x128xf32>, vector<1x128xf32>, vector<1x128xf32>, vector<1x128xf32>, vector<1x128xf32>, vector<1x128xf32>, vector<1x128xf32>, vector<1x128xf32>, vector<1x128xf32>, vector<1x128xf32>, vector<1x128xf32>, vector<1x128xf32>, vector<1x128xf32> -> vector<16x128xf32>
    %78 = tpu.concatenate %68, %69, %70, %71, %72, %73, %74, %75 in 0 : vector<1x128xf32>, vector<1x128xf32>, vector<1x128xf32>, vector<1x128xf32>, vector<1x128xf32>, vector<1x128xf32>, vector<1x128xf32>, vector<1x128xf32> -> vector<8x128xf32>
    %79 = tpu.concatenate %76, %77, %78 in 0 : vector<16x128xf32>, vector<16x128xf32>, vector<8x128xf32> -> vector<40x128xf32>
    %80 = tpu.transpose %79, [1, 0] : vector<40x128xf32> -> vector<128x40xf32>
    %81 = vector.extract_strided_slice %80 {offsets = [0, 0], sizes = [128, 39], strides = [1, 1]} : vector<128x40xf32> to vector<128x39xf32>
    %c0_9 = arith.constant 0 : index
    %c0_10 = arith.constant 0 : index
    %82 = vector.load %arg2[%c0_9, %c0_10] : memref<128x39xf32, #tpu.memory_space<vmem>>, vector<128x39xf32>
    tpu.vector_store %arg2[%c0_9, %c0_10], %81 {strides = array<i32>} : memref<128x39xf32, #tpu.memory_space<vmem>>, vector<128x39xf32>,
    return
  }
  func.func @transform_0(%arg0: i32) -> (i32, i32) {
    %c0_i32 = arith.constant 0 : i32
    %c0_i32_0 = arith.constant 0 : i32
    return %c0_i32, %arg0 : i32, i32
  }
  func.func @transform_1(%arg0: i32) -> (i32, i32) {
    %c0_i32 = arith.constant 0 : i32
    %c0_i32_0 = arith.constant 0 : i32
    return %arg0, %c0_i32 : i32, i32
  }
}

</mosaic_0001>

<bundles_post_ra>
// kernel: fourier_embed.1
= control target key start
LH: loop header
LB: loop body
LE: loop exit
PB: predicated region body
PF: predicated region fallthrough
CT: control target
= control target key end

     0   :  { %vm15_vm0 = vcmask 1042432   ;;  %s535_s0 = inlined_call_operand.vmem [shape: f32[3,16], index: 0, kind: input, shape index: {}]   ;;  %s536_s1 = inlined_call_operand.hbm [shape: f32[16,39], index: 1, kind: output, shape index: {}]  }
   0x1   :  { %v448_v0 = vld [vmem:[%s535_s0] sm:$0x7] }
   0x2   :  { %v10_v1 = vmul.f32 3.1415927, %v448_v0  ;;  %v11_v2 = vmul.f32 25.132742, %v448_v0 }
   0x4   :  { %v13_v3 = vrot.slane %v11_v2, 5 }
   0x5   :  { %6 = vsyncpa [#allocation3], 0  ;;  %v426_v16 = vmov 683565275   ;;  %v427_v18 = vmov 2475754826  }
   0x6   :  { %v453_v4 = vsel %vm15_vm0, %v10_v1, %v13_v3  ;;  %v428_v20 = vmov 2131351028   ;;  %v429_v22 = vmov 2102212464   ;;  %v430_v24 = vmov 920167782  }
   0x7   :  { %v20_v5 = vand.u32 2139095040, %v453_v4  ;;  %v17_v7 = vand.u32 2147483647, %v453_v4  ;;  %v431_v31 = vmov 1326507024   ;;  %vm19_vm8 = vcmp.lt.s32.totalorder %v453_v4, 0 }
   0x9   :  { %v21_v6 = vshrl.u32 %v20_v5, 23  ;;  %v24_v10 = vand.u32 8388607, %v17_v7  ;;  %vm18_vm9 = vcmp.le.f32.partialorder %v17_v7, 0.7853982 }
   0xb   :  { %v376_v8 = vadd.s32 4294967169, %v21_v6  ;;  %v25_v13 = vor.u32 8388608, %v24_v10 }
   0xd   :  { %v27_v9 = vadd.s32 1, %v376_v8  ;;  %v65_v33 = vshll.u32 %v25_v13, 8 }
   0xf   :  { %vm28_vm1 = vcmp.gt.s32.totalorder %v27_v9, 0 }
  0x10   :  { %v29_v11 = vsel %vm28_vm1, %v27_v9, 0  ;;  %vm109_vm1 = vweird.f32 %v453_v4 }
  0x11   :  { %v31_v12 = vand.u32 31, %v29_v11  ;;  %v30_v14 = vshrl.u32 %v29_v11, 5 }
  0x13   :  { %v32_v15 = vsub.s32 32, %v31_v12  ;;  %v34_v17 = vshll.u32 %v426_v16, %v31_v12  ;;  %v37_v19 = vshll.u32 %v427_v18, %v31_v12  ;;  %v40_v21 = vshll.u32 %v428_v20, %v31_v12 }
  0x14   :  { %v43_v23 = vshll.u32 %v429_v22, %v31_v12  ;;  %v46_v25 = vshll.u32 %v430_v24, %v31_v12  ;;  %vm49_vm2 = vcmp.lt.s32.totalorder %v30_v14, 1  ;;  %vm52_vm3 = vcmp.lt.s32.totalorder %v30_v14, 4 }
  0x15   :  { %v33_v26 = vshrl.u32 %v426_v16, %v32_v15  ;;  %v35_v27 = vshrl.u32 %v427_v18, %v32_v15  ;;  %v38_v28 = vshrl.u32 %v428_v20, %v32_v15  ;;  %v41_v29 = vshrl.u32 %v429_v22, %v32_v15 }
  0x16   :  { %v44_v30 = vshrl.u32 %v430_v24, %v32_v15  ;;  %v47_v32 = vshrl.u32 %v431_v31, %v32_v15  ;;  %vm50_vm4 = vcmp.lt.s32.totalorder %v30_v14, 2  ;;  %vm51_vm5 = vcmp.lt.s32.totalorder %v30_v14, 3 }
  0x17   :  { %v36_v34 = vor.u32 %v35_v27, %v34_v17  ;;  %v39_v35 = vor.u32 %v38_v28, %v37_v19  ;;  %v42_v36 = vor.u32 %v41_v29, %v40_v21 }
  0x18   :  { %v45_v37 = vor.u32 %v44_v30, %v43_v23  ;;  %v48_v38 = vor.u32 %v47_v32, %v46_v25 }
  0x19   :  { %v53_v39 = vsel %vm49_vm2, %v33_v26, %v36_v34  ;;  %v54_v40 = vsel %vm52_vm3, %v42_v36, 2102212464  ;;  %v57_v41 = vsel %vm49_vm2, %v36_v34, %v39_v35  ;;  %v61_v42 = vsel %vm49_vm2, %v39_v35, %v42_v36 }
  0x1a   :  { %v55_v43 = vsel %vm51_vm5, %v39_v35, %v54_v40  ;;  %v58_v44 = vsel %vm52_vm3, %v45_v37, 920167782  ;;  %v62_v45 = vsel %vm52_vm3, %v48_v38, 1326507024  ;;  %vm250_vm2 = vcmask 1043456  }
  0x1b   :  { %v59_v46 = vsel %vm51_vm5, %v42_v36, %v58_v44  ;;  %v63_v47 = vsel %vm51_vm5, %v45_v37, %v62_v45  ;;  %v56_v48 = vsel %vm50_vm4, %v53_v39, %v55_v43  ;;  %vm252_vm3 = vcmask 1044480  }
  0x1c   :  { %v60_v49 = vsel %vm50_vm4, %v57_v41, %v59_v46  ;;  %v64_v50 = vsel %vm50_vm4, %v61_v42, %v63_v47  ;;  %v72_v55 = vmul.u32 %v65_v33, %v56_v48  ;;  %vm254_vm4 = vcmask 1045504  }
  0x1d   :  { %v459_v51 = vmul.u32.u64.low %v65_v33, %v64_v50  ;;  %v460_v52 = vmul.u32.u64.high %v65_v33, %v64_v50, %v459_v51  ;;  %v462_v53 = vmul.u32.u64.low %v65_v33, %v60_v49  ;;  %v463_v54 = vmul.u32.u64.high %v65_v33, %v60_v49, %v462_v53 }
  0x1e   :  { %vm258_vm5 = vcmask 1040384  }
  0x1f   :  { %vm74_vm6 = vc.u32 %v460_v52, %v462_v53  ;;  %v75_v56 = vadd.s32 1, %v463_v54  ;;  %v73_v5 = vadd.s32 %v462_v53, %v460_v52 }
  0x21   :  { %v76_v57 = vsel %vm74_vm6, %v75_v56, %v463_v54  ;;  %vm260_vm6 = vcmask 1041408  }
  0x22   :  { %v77_v58 = vadd.s32 %v76_v57, %v72_v55 }
  0x24   :  { %v78_v59 = vadd.s32 536870912, %v77_v58 }
  0x26   :  { %v79_v60 = vshrl.u32 %v78_v59, 30 }
  0x28   :  { %v80_v61 = vshll.u32 %v79_v60, 30  ;;  %v103_v19 = vsub.s32 4, %v79_v60 }
  0x2a   :  { %v81_v62 = vsub.s32 %v77_v58, %v80_v61  ;;  %v104_v22 = vsel %vm19_vm8, %v103_v19, %v79_v60 }
  0x2b   :  { %v106_v24 = vsel %vm18_vm9, 0, %v104_v22 }
  0x2c   :  { %v83_v63 = vsub.s32 0, %v81_v62  ;;  %v110_v25 = vadd.s32 3, %v106_v24  ;;  %v214_v27 = vand.u32 3, %v106_v24 }
  0x2e   :  { %v377_v1 = vmin.u32 %v83_v63, %v81_v62  ;;  %v111_v26 = vand.u32 3, %v110_v25  ;;  %vm219_vm11 = vcmp.eq.s32.totalorder %v214_v27, 2  ;;  %vm216_vm13 = vcmp.eq.s32.totalorder %v214_v27, 0 }
  0x2f   :  { %vm215_vm15 = vcmp.lt.s32.totalorder %v214_v27, 2 }
  0x30   :  { %v85_v2 = vclz %v377_v1  ;;  %vm116_vm10 = vcmp.eq.s32.totalorder %v111_v26, 2  ;;  %vm113_vm12 = vcmp.eq.s32.totalorder %v111_v26, 0  ;;  %vm112_vm14 = vcmp.lt.s32.totalorder %v111_v26, 2 }
  0x32   :  { %v378_v3 = vadd.s32 4294967294, %v85_v2 }
  0x34   :  { %vm379_vm7 = vcmp.lt.s32.totalorder %v378_v3, 0 }
  0x35   :  { %v88_v6 = vsel %vm379_vm7, 0, %v378_v3  ;;  %vm256_vm7 = vcmask 1046528  }
  0x36   :  { %v89_v8 = vsub.s32 32, %v88_v6  ;;  %v90_v9 = vshll.u32 %v81_v62, %v88_v6  ;;  %v93_v10 = vsub.s32 4294967266, %v88_v6 }
  0x38   :  { %v91_v11 = vshrl.u32 %v73_v5, %v89_v8  ;;  %v94_v12 = vadd.s32 127, %v93_v10 }
  0x3a   :  { %v92_v13 = vor.u32 %v91_v11, %v90_v9  ;;  %v95_v14 = vshll.u32 %v94_v12, 23 }
  0x3c   :  { %v96_v15 = vor.u32 4788187, %v95_v14  ;;  %v99_v16 = vcvt.s32.f32 %v92_v13 }
  0x3e   :  { %v97_v17 = vand.u32 2147483647, %v96_v15 }
  0x40   :  { %v100_v18 = vmul.f32 %v99_v16, %v97_v17 }
  0x42   :  { %v101_v20 = vxor.u32 2147483648, %v100_v18 }
  0x44   :  { %v102_v21 = vsel %vm19_vm8, %v101_v20, %v100_v18  ;;  %vm343_vm8 = vcmask 318464  }
  0x45   :  { %v105_v23 = vsel %vm18_vm9, %v453_v4, %v102_v21 }
  0x46   :  { %400 = vcosq.f32 %v105_v23 }
  0x47   :  { %402 = vsinq.f32 %v105_v23 }
  0x53   :  { %v401_v28 = vpop.eup %400 }
  0x54   :  { %v403_v29 = vpop.eup %402  ;;  %v117_v30 = vxor.u32 2147483648, %v401_v28 }
  0x55   :  { %v114_v7 = vxor.u32 2147483648, %v403_v29 }
  0x56   :  { %v118_v31 = vsel %vm116_vm10, %v117_v30, %v403_v29  ;;  %v221_v32 = vsel %vm219_vm11, %v117_v30, %v403_v29 }
  0x57   :  { %v115_v33 = vsel %vm113_vm12, %v401_v28, %v114_v7  ;;  %v218_v34 = vsel %vm216_vm13, %v401_v28, %v114_v7 }
  0x58   :  { %v119_v35 = vsel %vm112_vm14, %v115_v33, %v118_v31  ;;  %v222_v36 = vsel %vm215_vm15, %v218_v34, %v221_v32 }
  0x59   :  { %v120_v37 = vsel %vm109_vm1, nan, %v119_v35  ;;  %v474_v38 = vsel %vm109_vm1, nan, %v222_v36 }
  0x5a   :  { %v224_v39 = vmul.f32 2.0, %v120_v37  ;;  %v226_v40 = vmul.f32 2.0, %v474_v38  ;;  %v235_v41 = vrot.slane %v120_v37, 5  ;;  %v247_v48 = vrot.slane %v120_v37, 3 }
  0x5b   :  { %v272_v53 = vrot.slane %v474_v38, 3  ;;  %v300_v60 = vrot.slane %v474_v38, 1 }
  0x5c   :  { %v225_v42 = vmul.f32 %v224_v39, %v474_v38  ;;  %v227_v43 = vmul.f32 %v226_v40, %v474_v38  ;;  %v249_v46 = vsel %vm15_vm0, %v448_v0, %v235_v41  ;;  %v280_v0 = vrot.slane %v474_v38, 6 }
  0x5e   :  { %v384_v44 = vadd.f32 -1.0, %v227_v43  ;;  %v229_v4 = vmul.f32 2.0, %v225_v42  ;;  %v238_v45 = vrot.slane %v225_v42, 4  ;;  %v267_v49 = vrot.slane %v225_v42, 2 }
  0x5f   :  { %v243_v52 = vrot.slane %v225_v42, 7 }
  0x60   :  { %v230_v47 = vmul.f32 %v384_v44, %v229_v4  ;;  %v231_v50 = vmul.f32 2.0, %v384_v44  ;;  %v251_v51 = vsel %vm250_vm2, %v249_v46, %v238_v45  ;;  %v275_v54 = vrot.slane %v384_v44, 2 }
  0x61   :  { %v282_v59 = vrot.slane %v384_v44, 5 }
  0x62   :  { %v241_v55 = vrot.slane %v230_v47, 3  ;;  %v245_v56 = vrot.slane %v230_v47, 6  ;;  %v269_v57 = vrot.slane %v230_v47, 1  ;;  %v232_v58 = vmul.f32 %v384_v44, %v231_v50 }
  0x63   :  { %v293_v6 = vsel %vm258_vm5, %v272_v53, %v275_v54 }
  0x64   :  { %v253_v61 = vsel %vm252_vm3, %v251_v51, %v241_v55  ;;  %v259_v62 = vsel %vm258_vm5, %v241_v55, %v120_v37  ;;  %v286_v63 = vsel %vm258_vm5, %v267_v49, %v269_v57  ;;  %v385_v1 = vadd.f32 -1.0, %v232_v58 }
  0x65   :  { %v255_v2 = vsel %vm254_vm4, %v253_v61, %v235_v41  ;;  %v261_v3 = vsel %vm260_vm6, %v259_v62, %v243_v52  ;;  %v287_v5 = vsel %vm260_vm6, %v286_v63, %v247_v48 }
  0x66   :  { %v257_v8 = vsel %vm256_vm7, %v255_v2, %v238_v45  ;;  %v262_v9 = vsel %vm15_vm0, %v261_v3, %v245_v56  ;;  %v278_v10 = vrot.slane %v385_v1, 1  ;;  %v288_v11 = vsel %vm15_vm0, %v287_v5, %v267_v49 }
  0x67   :  { %311 = vxpose.xlu0.b32.start [1/5] (short) %v257_v8, 128  ;;  %v263_v12 = vsel %vm250_vm2, %v262_v9, %v120_v37  ;;  %v289_v13 = vsel %vm250_vm2, %v288_v11, %v269_v57  ;;  %v284_v14 = vrot.slane %v385_v1, 4  ;;  %v302_v15 = vrot.slane %v385_v1, 7 }
  0x68   :  { %v264_v16 = vsel %vm252_vm3, %v263_v12, %v243_v52  ;;  %v290_v17 = vsel %vm252_vm3, %v289_v13, %v272_v53  ;;  %v294_v18 = vsel %vm260_vm6, %v293_v6, %v278_v10 }
  0x69   :  { %v265_v19 = vsel %vm254_vm4, %v264_v16, %v245_v56  ;;  %v291_v20 = vsel %vm254_vm4, %v290_v17, %v275_v54  ;;  %v295_v21 = vsel %vm15_vm0, %v294_v18, %v280_v0  ;;  %v304_v22 = vsel %vm258_vm5, %v284_v14, %v300_v60 }
  0x6a   :  { %v266_v23 = vsel %vm256_vm7, %v265_v19, %v247_v48  ;;  %v296_v24 = vsel %vm250_vm2, %v295_v21, %v282_v59  ;;  %v305_v25 = vsel %vm260_vm6, %v304_v22, %v384_v44  ;;  %v292_v28 = vsel %vm256_vm7, %v291_v20, %v278_v10 }
  0x6b   :  { %312 = vxpose.xlu0.b32.cont [2/5] (short) %v266_v23, 128  ;;  %v297_v26 = vsel %vm252_vm3, %v296_v24, %v284_v14  ;;  %v306_v27 = vsel %vm15_vm0, %v305_v25, %v302_v15 }
  0x6c   :  { %v307_v29 = vsel %vm250_vm2, %v306_v27, %v300_v60  ;;  %v298_v30 = vsel %vm254_vm4, %v297_v26, %v280_v0 }
  0x6d   :  { %v308_v7 = vsel %vm252_vm3, %v307_v29, %v384_v44  ;;  %v299_v31 = vsel %vm256_vm7, %v298_v30, %v282_v59 }
  0x6e   :  { %v309_v32 = vsel %vm254_vm4, %v308_v7, %v302_v15 }
  0x6f   :  { %313 = vxpose.xlu0.b32.cont [3/5] (short) %v292_v28, 128  ;;  %v310_v33 = vsel %vm256_vm7, %v309_v32, 0.0 }
  0x73   :  { %314 = vxpose.xlu0.b32.cont [4/5] (short) %v299_v31, 128 }
  0x77   :  { %315 = vxpose.xlu0.b32.end [5/5] (short) %v310_v33, 128 }
  0xe3   :  { %v327_v34 = vpop.trf.xlu0 }
  0xe4   :  { %344 = vst.msk [vmem:[#allocation2] sm:$0xff] %vm343_vm8, %v327_v34 }
  0xe7   :  { %v328_v35 = vpop.trf.xlu0 }
  0xe8   :  { %345 = vst.msk [vmem:[#allocation2 + $0x8] sm:$0xff] %vm343_vm8, %v328_v35 }
  0xeb   :  { %v329_v36 = vpop.trf.xlu0 }
  0xec   :  { %346 = vst.msk [vmem:[#allocation2 + $0x10] sm:$0xff] %vm343_vm8, %v329_v36 }
  0xef   :  { %v330_v37 = vpop.trf.xlu0 }
  0xf0   :  { %347 = vst.msk [vmem:[#allocation2 + $0x18] sm:$0xff] %vm343_vm8, %v330_v37 }
  0xf3   :  { %v331_v38 = vpop.trf.xlu0 }
  0xf4   :  { %348 = vst.msk [vmem:[#allocation2 + $0x20] sm:$0xff] %vm343_vm8, %v331_v38 }
  0xf7   :  { %v332_v39 = vpop.trf.xlu0 }
  0xf8   :  { %349 = vst.msk [vmem:[#allocation2 + $0x28] sm:$0xff] %vm343_vm8, %v332_v39 }
  0xfb   :  { %v333_v40 = vpop.trf.xlu0 }
  0xfc   :  { %350 = vst.msk [vmem:[#allocation2 + $0x30] sm:$0xff] %vm343_vm8, %v333_v40 }
  0xff   :  { %v334_v41 = vpop.trf.xlu0 }
 0x100   :  { %351 = vst.msk [vmem:[#allocation2 + $0x38] sm:$0xff] %vm343_vm8, %v334_v41 }
 0x103   :  { %v335_v42 = vpop.trf.xlu0 }
 0x104   :  { %352 = vst.msk [vmem:[#allocation2 + $0x40] sm:$0xff] %vm343_vm8, %v335_v42 }
 0x107   :  { %v336_v43 = vpop.trf.xlu0 }
 0x108   :  { %353 = vst.msk [vmem:[#allocation2 + $0x48] sm:$0xff] %vm343_vm8, %v336_v43 }
 0x10b   :  { %v337_v44 = vpop.trf.xlu0 }
 0x10c   :  { %354 = vst.msk [vmem:[#allocation2 + $0x50] sm:$0xff] %vm343_vm8, %v337_v44 }
 0x10f   :  { %v338_v4 = vpop.trf.xlu0 }
 0x110   :  { %355 = vst.msk [vmem:[#allocation2 + $0x58] sm:$0xff] %vm343_vm8, %v338_v4 }
 0x113   :  { %v339_v45 = vpop.trf.xlu0 }
 0x114   :  { %356 = vst.msk [vmem:[#allocation2 + $0x60] sm:$0xff] %vm343_vm8, %v339_v45 }
 0x117   :  { %v340_v46 = vpop.trf.xlu0 }
 0x118   :  { %357 = vst.msk [vmem:[#allocation2 + $0x68] sm:$0xff] %vm343_vm8, %v340_v46 }
 0x11b   :  { %v341_v47 = vpop.trf.xlu0 }
 0x11c   :  { %358 = vst.msk [vmem:[#allocation2 + $0x70] sm:$0xff] %vm343_vm8, %v341_v47 }
 0x11f   :  { %v342_v48 = vpop.trf.xlu0 }
 0x120   :  { %359 = vst.msk [vmem:[#allocation2 + $0x78] sm:$0xff] %vm343_vm8, %v342_v48 }
 0x121   :  { %364 = vsyncadd [#allocation3], 1792  ;;  %s432_s0 = smov [#allocation2]  }
 0x122   :  { %s365_s8 = sshll.u32 %s432_s0, 4  ;;  %s366_s8 = int_to_ptr.vmem [resolvable:$true] %s365_s8 }
 0x123   :  { %s404_s9 = scalar_lea.vmem %s366_s8, 256  ;;  %s408_s10 = scalar_lea.vmem %s366_s8, 2048 }
 0x124   :  { %p405_p0 = scmp.ne.s32.totalorder %s366_s8, %s404_s9  ;;  %p409_p1 = scmp.lt.s32.totalorder %s366_s8, %s366_s8 }
 0x125   :  { %p410_p2 = scmp.lt.s32.totalorder %s408_s10, %s404_s9 }
 0x127   :  { %p411_p3 = por %p410_p2, %p409_p1 }
 0x129   :  { %p412_p4 = pnand %p411_p3, %p405_p0 }
 0x12b   :  { %415 = shalt.err (!%p412_p4)
}
 0x12c   :  { %s433_s11 = smov 128   ;;  %s434_s12 = smov 8  }
 0x12d   :  { %371 = dma.vmem_to_hbm [thread:$0]  %s366_s8, 256, %s536_s1, [#allocation3], %s433_s11, %s433_s11, %s434_s12  }
 0x12e   :  { %424 = dma.done.wait [#allocation3], 2048  }
 0x12f   :  { %425 = vsyncadd [#allocation3], 4294965248 }
 0x130   :  { %375 = vsyncpa [#allocation3], 1 }

</bundles_post_ra>
